<compile_context>
chip_gen: v6e
topology: v6e:2x2x1
jax: 0.10.0
libtpu: 0.0.40
codegen_flags: <defaults>
</compile_context>

<pallas_src>
import jax
import jax.numpy as jnp
from jax.experimental import pallas as pl
from jax.experimental.pallas import tpu as pltpu

_LANE = 128                              # f32 lane width
_SUBLANE = 8                             # f32 sublane width
_K_WHOLE_MAX = 2048                      # keep whole feature dim per block up to this
_TK_CHUNK = 512                          # feature-chunk size when F is large
_VMEM_DATA_BUDGET = 24 * 1024 * 1024     # bytes of pipelined buffers we target
_VMEM_LIMIT_BYTES = 48 * 1024 * 1024     # explicit scoped-VMEM limit (v7x-safe)
_PALLAS_MIN_X_ELEMS = 1 << 16            # below this many x elements, XLA wins


def _round_up(v, m):
    return (v + m - 1) // m * m


def _linear_kernel(x_ref, w_ref, b_ref, o_ref, acc_ref):
    """One (TB, TK) x-tile times one (TK, Cpad) W^T-tile, accumulated in f32."""
    k = pl.program_id(1)

    @pl.when(k == 0)
    def _():
        acc_ref[...] = jnp.zeros_like(acc_ref)

    acc_ref[...] += jnp.dot(x_ref[...], w_ref[...],
                            preferred_element_type=jnp.float32)

    @pl.when(k == pl.num_programs(1) - 1)
    def _():
        # f32 epilogue (bias add); cast only at the store (v5e-friendly).
        o_ref[...] = (acc_ref[...] + b_ref[...]).astype(o_ref.dtype)


class PallasLogisticRegression:
    """Pallas-TPU forward for nn.Linear(n_features, n_classes) logits.

    Weight/bias are prepared (transposed, zero-padded to lane-dense shapes)
    once at construction, so the per-call hot path never pays a transpose or a
    masked sub-128-lane store.
    """

    def __init__(self, weight, bias, *, block_b=512, block_k=None):
        # weight: (n_classes, n_features)  -- PyTorch nn.Linear layout.
        # bias:   (n_classes,)
        self.n_classes = int(weight.shape[0])
        self.n_features = int(weight.shape[1])
        self.block_b = int(block_b)

        if block_k is None:
            self.tk = (self.n_features if self.n_features <= _K_WHOLE_MAX
                       else _TK_CHUNK)
        else:
            self.tk = int(block_k)
        if self.tk != self.n_features and self.tk % _LANE != 0:
            raise ValueError("block_k must be a multiple of 128 when it chunks F")

        self.fpad = (self.n_features if self.tk == self.n_features
                     else _round_up(self.n_features, self.tk))
        self.cpad = _round_up(self.n_classes, _LANE)

        # One-time prep: W^T zero-padded to (Fpad, Cpad); bias to (1, Cpad) f32.
        w_t = jnp.zeros((self.fpad, self.cpad), dtype=weight.dtype)
        self.w_t = w_t.at[: self.n_features, : self.n_classes].set(weight.T)
        b2d = jnp.zeros((1, self.cpad), dtype=jnp.float32)
        self.b2d = b2d.at[0, : self.n_classes].set(bias.astype(jnp.float32))

    def _batch_tile(self, batch):
        # VMEM budget: double-buffered x tile + double-buffered out tile +
        # f32 accumulator (per row), plus double-buffered weight tile + bias.
        bytes_per_row = 4 * (2 * self.tk + 3 * self.cpad)
        weight_bytes = 4 * (2 * self.tk * self.cpad + 2 * self.cpad)
        tb = max(_SUBLANE, (_VMEM_DATA_BUDGET - weight_bytes) // bytes_per_row)
        tb = min(tb, self.block_b)
        b_all = _round_up(batch, _SUBLANE)
        if tb >= b_all:
            return int(b_all)                     # whole (padded) batch, one tile
        if tb >= _LANE:
            tb = (tb // _LANE) * _LANE            # MXU-friendly multiple of 128
        else:
            tb = max(_SUBLANE, (tb // _SUBLANE) * _SUBLANE)
        return int(tb)

    def __call__(self, x, *, use_pallas=None):
        batch, feats = x.shape
        assert feats == self.n_features
        if use_pallas is None:
            use_pallas = batch * feats >= _PALLAS_MIN_X_ELEMS
        if not use_pallas:
            # Tiny problem: a Pallas dispatch is pure fixed overhead; let XLA
            # fuse the whole thing (weight is already pre-transposed).
            out = (x @ self.w_t[:feats, : self.n_classes]
                   + self.b2d[0, : self.n_classes])
            return out.astype(x.dtype)

        tb = self._batch_tile(batch)
        bpad = _round_up(batch, tb)
        x_p = x
        if bpad != batch or self.fpad != feats:
            x_p = jnp.pad(x, ((0, bpad - batch), (0, self.fpad - feats)))

        grid = (bpad // tb, self.fpad // self.tk)
        out = pl.pallas_call(
            _linear_kernel,
            out_shape=jax.ShapeDtypeStruct((bpad, self.cpad), x.dtype),
            grid=grid,
            in_specs=[
                pl.BlockSpec((tb, self.tk), lambda i, k: (i, k)),          # x
                pl.BlockSpec((self.tk, self.cpad), lambda i, k: (k, 0)),   # W^T
                pl.BlockSpec((1, self.cpad), lambda i, k: (0, 0)),         # bias
            ],
            out_specs=pl.BlockSpec((tb, self.cpad), lambda i, k: (i, 0)),
            scratch_shapes=[pltpu.VMEM((tb, self.cpad), jnp.float32)],
            compiler_params=pltpu.CompilerParams(
                dimension_semantics=("parallel", "arbitrary"),
                vmem_limit_bytes=_VMEM_LIMIT_BYTES,
            ),
        )(x_p, self.w_t, self.b2d)
        return out[:batch, : self.n_classes]


if __name__ == "__main__":
    key = jax.random.PRNGKey(0)
    kx, kw, kb, kx2 = jax.random.split(key, 4)

    # --- main case: exercises the real tiled Pallas path -------------------
    batch, n_features, n_classes = 320, 256, 10
    x = jax.random.normal(kx, (batch, n_features), dtype=jnp.float32)
    weight = jax.random.normal(kw, (n_classes, n_features), jnp.float32) * 0.1
    bias = jax.random.normal(kb, (n_classes,), jnp.float32) * 0.1

    # block_b/block_k chosen small so the demo runs a multi-tile grid
    # (3 batch tiles x 2 feature chunks) even at these small shapes.
    model = PallasLogisticRegression(weight, bias, block_b=128, block_k=128)
    out = jax.block_until_ready(model(x, use_pallas=True))
    ref = x @ weight.T + bias
    assert out.shape == (batch, n_classes)
    assert jnp.allclose(out, ref, atol=1e-4, rtol=1e-5)

    # --- tiny hw1-q2-style shapes: auto path falls back to XLA; forcing the
    #     Pallas path still works (single full tile, padded output sliced).
    bt, ft, ct = 8, 32, 4
    xt = jax.random.normal(kx2, (bt, ft), dtype=jnp.float32)
    wt = weight[:ct, :ft]
    bs = bias[:ct]
    tiny = PallasLogisticRegression(wt, bs)
    out_auto = jax.block_until_ready(tiny(xt))                      # XLA fallback
    out_pall = jax.block_until_ready(tiny(xt, use_pallas=True))     # Pallas path
    ref_t = xt @ wt.T + bs
    assert jnp.allclose(out_auto, ref_t, atol=1e-4, rtol=1e-5)
    assert jnp.allclose(out_pall, ref_t, atol=1e-4, rtol=1e-5)

    print("KERNEL_OK")
</pallas_src>

<mosaic_0001>
module attributes {stable_mosaic.version = 11 : i64} {
  func.func @_linear_kernel(%arg0: i32, %arg1: i32, %arg2: memref<128x128xf32, #tpu.memory_space<vmem>>, %arg3: memref<128x128xf32, #tpu.memory_space<vmem>>, %arg4: memref<1x128xf32, #tpu.memory_space<vmem>>, %arg5: memref<128x128xf32, #tpu.memory_space<vmem>>, %arg6: memref<128x128xf32, #tpu.memory_space<vmem>>) attributes {dimension_semantics = [#tpu.dimension_semantics<parallel>, #tpu.dimension_semantics<arbitrary>], iteration_bounds = array<i64: 3, 2>, scalar_prefetch = 0 : i64, scratch_operands = 1 : i64, tpu.core_type = #tpu.core_type<tc>, window_params = [{transform_indices = @transform_0, window_bounds = array<i64: 128, 128>}, {transform_indices = @transform_1, window_bounds = array<i64: 128, 128>}, {pipeline_mode = #tpu.pipeline_mode<synchronous>, transform_indices = @transform_2, window_bounds = array<i64: 1, 128>}, {transform_indices = @transform_3, window_bounds = array<i64: 128, 128>}]} {
    %c0_i32 = arith.constant 0 : i32
    %0 = arith.cmpi eq, %arg1, %c0_i32 : i32
    %1 = arith.extui %0 : i1 to i32
    %c0_i32_0 = arith.constant 0 : i32
    %2 = arith.cmpi ne, %1, %c0_i32_0 : i32
    scf.if %2 {
      %cst_9 = arith.constant 0.000000e+00 : f32
      %12 = vector.broadcast %cst_9 : f32 to vector<128x128xf32>
      %c0_10 = arith.constant 0 : index
      %c0_11 = arith.constant 0 : index
      %13 = vector.load %arg6[%c0_10, %c0_11] : memref<128x128xf32, #tpu.memory_space<vmem>>, vector<128x128xf32>
      tpu.vector_store %arg6[%c0_10, %c0_11], %12 {strides = array<i32>} : memref<128x128xf32, #tpu.memory_space<vmem>>, vector<128x128xf32>,
    } else {
    }
    %c0 = arith.constant 0 : index
    %c0_1 = arith.constant 0 : index
    %3 = vector.load %arg6[%c0, %c0_1] : memref<128x128xf32, #tpu.memory_space<vmem>>, vector<128x128xf32>
    %c0_2 = arith.constant 0 : index
    %c0_3 = arith.constant 0 : index
    %4 = vector.load %arg2[%c0_2, %c0_3] : memref<128x128xf32, #tpu.memory_space<vmem>>, vector<128x128xf32>
    %c0_4 = arith.constant 0 : index
    %c0_5 = arith.constant 0 : index
    %5 = vector.load %arg3[%c0_4, %c0_5] : memref<128x128xf32, #tpu.memory_space<vmem>>, vector<128x128xf32>
    %cst = arith.constant dense<0.000000e+00> : vector<128x128xf32>
    %6 = tpu.matmul %4, %5, %cst {dimension_numbers = #tpu.dot_dimension_numbers<[1], [0], [0], [1], [0, 0, 1, 1], [], []>} : vector<128x128xf32>, vector<128x128xf32>, vector<128x128xf32> -> vector<128x128xf32>
    %7 = arith.addf %3, %6 : vector<128x128xf32>
    %c0_6 = arith.constant 0 : index
    %c0_7 = arith.constant 0 : index
    %8 = vector.load %arg6[%c0_6, %c0_7] : memref<128x128xf32, #tpu.memory_space<vmem>>, vector<128x128xf32>
    tpu.vector_store %arg6[%c0_6, %c0_7], %7 {strides = array<i32>} : memref<128x128xf32, #tpu.memory_space<vmem>>, vector<128x128xf32>,
    %c1_i32 = arith.constant 1 : i32
    %9 = arith.cmpi eq, %arg1, %c1_i32 : i32
    %10 = arith.extui %9 : i1 to i32
    %c0_i32_8 = arith.constant 0 : i32
    %11 = arith.cmpi ne, %10, %c0_i32_8 : i32
    scf.if %11 {
      %c0_9 = arith.constant 0 : index
      %c0_10 = arith.constant 0 : index
      %12 = vector.load %arg6[%c0_9, %c0_10] : memref<128x128xf32, #tpu.memory_space<vmem>>, vector<128x128xf32>
      %c0_11 = arith.constant 0 : index
      %c0_12 = arith.constant 0 : index
      %13 = vector.load %arg4[%c0_11, %c0_12] : memref<1x128xf32, #tpu.memory_space<vmem>>, vector<1x128xf32>
      %14 = vector.broadcast %13 : vector<1x128xf32> to vector<128x128xf32>
      %15 = arith.addf %12, %14 : vector<128x128xf32>
      %c0_13 = arith.constant 0 : index
      %c0_14 = arith.constant 0 : index
      %16 = vector.load %arg5[%c0_13, %c0_14] : memref<128x128xf32, #tpu.memory_space<vmem>>, vector<128x128xf32>
      tpu.vector_store %arg5[%c0_13, %c0_14], %15 {strides = array<i32>} : memref<128x128xf32, #tpu.memory_space<vmem>>, vector<128x128xf32>,
    } else {
    }
    return
  }
  func.func @transform_0(%arg0: i32, %arg1: i32) -> (i32, i32) {
    %c0_i32 = arith.constant 0 : i32
    return %arg0, %arg1 : i32, i32
  }
  func.func @transform_1(%arg0: i32, %arg1: i32) -> (i32, i32) {
    %c0_i32 = arith.constant 0 : i32
    %c0_i32_0 = arith.constant 0 : i32
    return %arg1, %c0_i32 : i32, i32
  }
  func.func @transform_2(%arg0: i32, %arg1: i32) -> (i32, i32) {
    %c0_i32 = arith.constant 0 : i32
    %c0_i32_0 = arith.constant 0 : i32
    %c0_i32_1 = arith.constant 0 : i32
    return %c0_i32, %c0_i32_0 : i32, i32
  }
  func.func @transform_3(%arg0: i32, %arg1: i32) -> (i32, i32) {
    %c0_i32 = arith.constant 0 : i32
    %c0_i32_0 = arith.constant 0 : i32
    return %arg0, %c0_i32 : i32, i32
  }
}

</mosaic_0001>

<bundles_post_ra>
// kernel: tpu_custom_call.1
= control target key start
LH: loop header
LB: loop body
LE: loop exit
PB: predicated region body
PF: predicated region fallthrough
CT: control target
= control target key end

     0   :  { %s1541_s0 = inlined_call_operand.hbm [shape: f32[384,256], index: 0, kind: input, shape index: {}]   ;;  %s1542_s1 = inlined_call_operand.hbm [shape: f32[256,128], index: 1, kind: input, shape index: {}]   ;;  %s1543_s2 = inlined_call_operand.vmem [shape: f32[1,128], index: 2, kind: input, shape index: {}]   ;;  %s1544_s3 = inlined_call_operand.hbm [shape: f32[384,128], index: 3, kind: output, shape index: {}]  }
   0x1   :  { %1551 = sst [smem:[#allocation17_spill]] %s1541_s0 }
   0x2   :  { %1552 = sst [smem:[#allocation18_spill]] %s1542_s1 }
   0x3   :  { %1553 = sst [smem:[#allocation19_spill]] %s1543_s2 }
   0x4   :  { %1554 = sst [smem:[#allocation20_spill]] %s1544_s3 }
   0x5   :  { %8 = vsyncpa [#allocation4], 0 }
   0x6   :  { %10 = vsyncpa [#allocation4 + $0x1], 0 }
   0x7   :  { %11 = vsyncpa [#allocation7], 0 }
   0x8   :  { %13 = vsyncpa [#allocation7 + $0x1], 0 }
   0x9   :  { %14 = vsyncpa [#allocation5], 0 }
   0xa   :  { %16 = vsyncpa [#allocation5 + $0x1], 0  ;;  %s1193_s12 = smov 0   ;;  %s1195_s13 = smov 0  }
   0xb   :  { %s1197_s14 = smov 0   ;;  %s1199_s15 = smov 0  }
   0xc   :  { %s1201_s16 = smov 0   ;;  %s1203_s17 = smov 0  }
   0xd   :  { %s1205_s18 = smov 0   ;;  %s1207_s19 = smov 0  }
   0xe   :  { %s1209_s20 = smov 0   ;;  %s1211_s21 = smov 0  }
   0xf   :  { %s1213_s22 = smov 0   ;;  %s1215_s23 = smov 0  }
  0x10   :  { %s1217_s24 = smov 0   ;;  %s1219_s25 = smov 0  }
  0x11 LB: > { %1555 = sst [smem:[#allocation12_spill]] %s1110_s12  ;;  %s31_s26 = sadd.s32 1, %s1154_s23  ;;  %s1162_s25 = sphi %s1219_s25, %s22_s25   ;;  %s1158_s24 = sphi %s1217_s24, %s1595_s24   ;;  %s1154_s23 = sphi %s1215_s23, %s1594_s23   ;;  %s1150_s22 = sphi %s1213_s22, %s1593_s22   ;;  %s1146_s21 = sphi %s1211_s21, %s1592_s21   ;;  %s1142_s20 = sphi %s1209_s20, %s1591_s20   ;;  %s1138_s19 = sphi %s1207_s19, %s1590_s19   ;;  %s1134_s18 = sphi %s1205_s18, %s1589_s18   ;;  %s1130_s17 = sphi %s1203_s17, %s1588_s17   ;;  %s1126_s16 = sphi %s1201_s16, %s1587_s16   ;;  %s1122_s15 = sphi %s1199_s15, %s1586_s15   ;;  %s1118_s14 = sphi %s1197_s14, %s1585_s14   ;;  %s1114_s13 = sphi %s1195_s13, %s1584_s13   ;;  %s1110_s12 = sphi %s1193_s12, %s1583_s12  }
  0x12   : > { %1556 = sst [smem:[#allocation13_spill]] %s1146_s21  ;;  %s34_s27 = sadd.s32 1, %s1158_s24 }
  0x13   : > { %1557 = sst [smem:[#allocation14_spill]] %s1150_s22  ;;  %p32_p0 = scmp.ge.s32.totalorder %s31_s26, 2 }
  0x14   : > { %s43_s28 = sadd.s32 1, %s1142_s20  ;;  %p50_p1 = scmp.ne.s32.totalorder %s1142_s20, %s1138_s19 }
  0x15   : > { %p51_p2 = scmp.eq.s32.totalorder %s1162_s25, 0  ;;  %s1597_s26 = smov (%p32_p0, %s31_s26), 0 }
  0x16   : > { %1558 = sst [smem:[#allocation15_spill]] %s1597_s26  ;;  %s1599_s27 = smov (!%p32_p0, %s34_s27), %s1158_s24 }
  0x17   : > { %s1274_s29 = ssub.s32 %s1154_s23, %s1597_s26  ;;  %p1278_p3 = por %p51_p2, %p50_p1 }
  0x18   : > { %p36_p4 = scmp.ge.s32.totalorder %s1599_s27, 3  ;;  %p56_p5 = scmp.ne.s32.totalorder %s1138_s19, %s1134_s18 }
  0x19   : > { %p67_p6 = scmp.eq.s32.totalorder %s1274_s29, 0  ;;  %s116_s4 = sadd.s32 1, %s1118_s14 }
  0x1a   : > { %s1601_s27 = smov (%p36_p4, %s1599_s27), 0  ;;  %p1547_p7 = scmp.lt.s32.totalorder %s1162_s25, 6 }
  0x1b   : > { %1560 = sst [smem:[#allocation16_spill]] %s1601_s27  ;;  %s38_s5 = ssub.s32 %s1158_s24, %s1601_s27 }
  0x1c   : > { %s156_s6 = sand.u32 1, %s1142_s20   ;;  %s40_s7 = sor.u32 %s1274_s29, %s38_s5 }
  0x1d   : > { %p114_p8 = scmp.eq.s32.totalorder %s38_s5, 0  ;;  %p41_p9 = scmp.eq.s32.totalorder %s40_s7, 0 }
  0x1e   : > { %s679_s10 = sshll.u32 %s156_s6, 7  ;;  %s698_s11 = sshll.u32 %s1158_s24, 5 }
  0x1f   : > { %s1294_s8 = scalar_select %p114_p8, %s1118_s14, %s116_s4  }
  0x20   : > { %s1297_s9 = scalar_select %p41_p9, %s1142_s20, %s43_s28  }
  0x21   : > { %s166_s26 = sadd.s32 %s1154_s23, %s698_s11  ;;  %s160_s22 = scalar_lea.vmem [#allocation3], %s679_s10 }
  0x22   : > { %s682_s3 = sshll.u32 %s166_s26, 7  ;;  %s169_s2 = sshll.u32 %s160_s22, 4  ;;  %s170_s2 = int_to_ptr.vmem [resolvable:$true] %s169_s2 }
  0x23   : > { %s1561_s0 = sld [smem:[#allocation17_spill]]  ;;  %p1308_p10 = pnand %p1547_p7, %p1278_p3 }
  0x24   : > { %p686_p11 = scmp.ge.s32.totalorder %s1162_s25, 1  ;;  %s157_s28 = scalar_lea.sflag [#allocation4], %s156_s6 }
  0x25   : > { %p960_p12 = pneg %p1308_p10  ;;  %s971_s4 = scalar_lea.vmem %s170_s2, 2048 }
  0x26   : > { %p972_p13 = scmp.ne.s32.totalorder %s170_s2, %s971_s4  ;;  %s1164_s22 = smov [#allocation3]  }
  0x27   : > { %s976_s26 = sshll.u32 %s1164_s22, 4  ;;  %s977_s26 = int_to_ptr.vmem [resolvable:$false] %s976_s26 }
  0x28   : > { %p974_p0 = pnand %p972_p13, %p960_p12  ;;  %s978_s1 = scalar_lea.vmem %s977_s26, 4096 }
  0x29   : > { %s168_s12 = scalar_lea.hbm %s1561_s0, %s682_s3  ;;  %p979_p4 = scmp.lt.s32.totalorder %s170_s2, %s977_s26 }
  0x2a   : > { %p975_p1 = pneg %p974_p0  ;;  %p980_p8 = scmp.lt.s32.totalorder %s978_s1, %s971_s4 }
  0x2c   : > { %p981_p9 = por %p980_p8, %p979_p4 }
  0x2e   : > { %p982_p3 = pnand %p981_p9, %p975_p1 }
  0x30   : > { %985 = shalt.err (!%p982_p3)
}
  0x31   : > { %s1165_s3 = smov 256   ;;  %s1548_s21 = smov 128  }
  0x32   : > { %s1549_s30 = smov 8   ;;  %s1563_s6 = sld [smem:[#allocation12_spill]] }
  0x33   : > { %830 = dma.hbm_to_vmem [thread:$0]  (!%p1308_p10), %s168_s12, 2048, %s170_s2, %s157_s28, %s1165_s3, %s1548_s21, %s1549_s30  }
  0x34   : > { %p198_p12 = scmp.lt.s32.totalorder %s1162_s25, 7  ;;  %s675_s10 = sadd.s32 4294967295, %s1162_s25  }
  0x35   : > { %s676_s11 = sadd.s32 4294967294, %s1162_s25   ;;  %p57_p0 = scmp.eq.s32.totalorder %s675_s10, 0 }
  0x36   : > { %p1322_p13 = pnand %p686_p11, %p198_p12  ;;  %s69_s4 = sadd.s32 1, %s1130_s17 }
  0x37   : > { %s1332_s22 = scalar_select %p67_p6, %s1130_s17, %s69_s4  }
  0x38   : > { %p1337_p1 = por %p57_p0, %p56_p5  ;;  %p76_p10 = scmp.ne.s32.totalorder %s1130_s17, %s1126_s16 }
  0x39   : > { %p82_p11 = scmp.ne.s32.totalorder %s1126_s16, %s1122_s15  ;;  %p126_p4 = scmp.ne.s32.totalorder %s1118_s14, %s1114_s13 }
  0x3a   : > { %p78_p8 = por %p76_p10, %p51_p2  ;;  %p127_p9 = scmp.eq.s32.totalorder %s675_s10, 5 }
  0x3b   : > { %p1349_p3 = por %p82_p11, %p57_p0  ;;  %p132_p12 = scmp.ne.s32.totalorder %s1114_s13, %s1563_s6 }
  0x3c   : > { %p1355_p7 = por %p127_p9, %p126_p4  ;;  %p133_p6 = scmp.eq.s32.totalorder %s676_s11, 5 }
  0x3d   : > { %s179_s18 = sand.u32 1, %s1130_s17   ;;  %s699_s29 = sshll.u32 %s1154_s23, 11 }
  0x3e   : > { %p1361_p5 = por %p133_p6, %p132_p12  ;;  %s683_s15 = sshll.u32 %s179_s18, 7 }
  0x3f   : > { %s1569_s3 = sld [smem:[#allocation18_spill]]  ;;  %p1570_p2 = scmp.lt.s32.totalorder %s1162_s25, 6 }
  0x40   : > { %s183_s6 = scalar_lea.vmem [#allocation6], %s683_s15  ;;  %s180_s11 = scalar_lea.sflag [#allocation7], %s179_s18 }
  0x41   : > { %p1370_p0 = pnand %p1570_p2, %p78_p8  ;;  %s190_s21 = sshll.u32 %s183_s6, 4  ;;  %s191_s21 = int_to_ptr.vmem [resolvable:$true] %s190_s21 }
  0x42   : > { %s999_s30 = scalar_lea.vmem %s191_s21, 2048  ;;  %s1168_s0 = smov [#allocation6]  }
  0x43   : > { %p988_p10 = pneg %p1370_p0  ;;  %p1000_p11 = scmp.ne.s32.totalorder %s191_s21, %s999_s30 }
  0x44   : > { %s1004_s27 = sshll.u32 %s1168_s0, 4  ;;  %s1005_s27 = int_to_ptr.vmem [resolvable:$false] %s1004_s27 }
  0x45   : > { %s189_s10 = scalar_lea.hbm %s1569_s3, %s699_s29  ;;  %p1002_p4 = pnand %p1000_p11, %p988_p10 }
  0x46   : > { %s1006_s29 = scalar_lea.vmem %s1005_s27, 4096  ;;  %p1007_p12 = scmp.lt.s32.totalorder %s191_s21, %s1005_s27 }
  0x47   : > { %p1003_p9 = pneg %p1002_p4  ;;  %p1008_p8 = scmp.lt.s32.totalorder %s1006_s29, %s999_s30 }
  0x49   : > { %p1009_p6 = por %p1008_p8, %p1007_p12 }
  0x4b   : > { %p1010_p2 = pnand %p1009_p6, %p1003_p9 }
  0x4d   : > { %1013 = shalt.err (!%p1010_p2)
}
  0x4e   : > { %s1572_s15 = smov 8   ;;  %s1573_s26 = smov 128  }
  0x4f   : > { %833 = dma.hbm_to_vmem [thread:$0]  (!%p1370_p0), %s189_s10, 2048, %s191_s21, %s180_s11, %s1573_s26, %s1573_s26, %s1572_s15  }
  0x50   : > { %202 = sbr.rel (%p1322_p13) target bundleno = 392 (0x188), region = 32  ;;  %s204_s18 = sand.u32 (!%p1322_p13), 1, %s1138_s19  }
  0x51   : > { %s687_s0 = sshll.u32 (!%p1322_p13), %s204_s18, 7  ;;  %s205_s1 = scalar_lea.sflag (!%p1322_p13), [#allocation4], %s204_s18 }
  0x52   : > { %s1384_s3 = scalar_lea.vmem (!%p1322_p13), [#allocation3], %s687_s0 }
  0x55   : > { %1097 = dma.done.wait (%p1337_p1), %s205_s1, 2048  }
  0x56   : > { %1099 = vsyncadd (%p1337_p1), %s205_s1, 4294965248  ;;  %s213_s27 = sand.u32 1, %s1126_s16  }
  0x57   : > { %s688_s30 = sshll.u32 %s213_s27, 7  ;;  %s214_s21 = scalar_lea.sflag [#allocation7], %s213_s27 }
  0x58   : > { %s1391_s10 = scalar_lea.vmem [#allocation6], %s688_s30 }
  0x59   : > { %1101 = dma.done.wait (%p1349_p3), %s214_s21, 2048  }
  0x5a   : > { %1103 = vsyncadd (%p1349_p3), %s214_s21, 4294965248  ;;  %s242_s7 = sand.u32 1, %s1114_s13   ;;  %s1574_s5 = sld [smem:[#allocation13_spill]] }
  0x5b   : > { %s689_s4 = sshll.u32 %s242_s7, 7 }
  0x5c   : > { %s1400_s6 = scalar_lea.vmem [#allocation8], %s689_s4 }
  0x60   : > { %p690_p13 = scmp.ne.s32.totalorder %s1574_s5, 0 }
  0x62   : > { %251 = sbr.rel (%p690_p13) target bundleno = 112 (0x70), region = 44 }
  0x67   : > { %v1169_v0 = vmov 0.0  }
  0x68   : > { %252 = vst [vmem:[#allocation2 + $0x30] sm:$0xff] %v1169_v0  ;;  %253 = vst [vmem:[#allocation2] sm:$0xff] %v1169_v0 }
  0x69   : > { %254 = vst [vmem:[#allocation2 + $0x58] sm:$0xff] %v1169_v0  ;;  %255 = vst [vmem:[#allocation2 + $0x18] sm:$0xff] %v1169_v0 }
  0x6a   : > { %256 = vst [vmem:[#allocation2 + $0x50] sm:$0xff] %v1169_v0  ;;  %257 = vst [vmem:[#allocation2 + $0x68] sm:$0xff] %v1169_v0 }
  0x6b   : > { %258 = vst [vmem:[#allocation2 + $0x8] sm:$0xff] %v1169_v0  ;;  %259 = vst [vmem:[#allocation2 + $0x48] sm:$0xff] %v1169_v0 }
  0x6c   : > { %260 = vst [vmem:[#allocation2 + $0x40] sm:$0xff] %v1169_v0  ;;  %261 = vst [vmem:[#allocation2 + $0x20] sm:$0xff] %v1169_v0 }
  0x6d   : > { %262 = vst [vmem:[#allocation2 + $0x10] sm:$0xff] %v1169_v0  ;;  %263 = vst [vmem:[#allocation2 + $0x38] sm:$0xff] %v1169_v0 }
  0x6e   : > { %264 = vst [vmem:[#allocation2 + $0x60] sm:$0xff] %v1169_v0  ;;  %265 = vst [vmem:[#allocation2 + $0x70] sm:$0xff] %v1169_v0 }
  0x6f   : > { %266 = vst [vmem:[#allocation2 + $0x78] sm:$0xff] %v1169_v0  ;;  %267 = vst [vmem:[#allocation2 + $0x28] sm:$0xff] %v1169_v0 }
  0x70 PF: > { %v315_v1 = vld [vmem:[%s1391_s10 + $0x78] sm:$0xff]  ;;  %v314_v2 = vld [vmem:[%s1391_s10 + $0x70] sm:$0xff]  ;;  %v313_v3 = vld [vmem:[%s1391_s10 + $0x68] sm:$0xff]  ;;  %s1575_s2 = sld [smem:[#allocation13_spill]] }
  0x71   : > { %733 = vmatprep.subr.mxu0 %v315_v1  ;;  %789 = vmatprep.subr.mxu1 %v315_v1  ;;  %v312_v4 = vld [vmem:[%s1391_s10 + $0x60] sm:$0xff]  ;;  %v311_v5 = vld [vmem:[%s1391_s10 + $0x58] sm:$0xff]  ;;  %v310_v6 = vld [vmem:[%s1391_s10 + $0x50] sm:$0xff] }
  0x72   : > { %734 = vmatpush3.msra.mxu0 %v315_v1  ;;  %805 = vmatpush3.msra.mxu1 %v315_v1  ;;  %v309_v7 = vld [vmem:[%s1391_s10 + $0x48] sm:$0xff]  ;;  %v308_v8 = vld [vmem:[%s1391_s10 + $0x40] sm:$0xff]  ;;  %v307_v9 = vld [vmem:[%s1391_s10 + $0x38] sm:$0xff] }
  0x73   : > { %735 = vmatprep.subr.mxu0 %v314_v2  ;;  %790 = vmatprep.subr.mxu1 %v314_v2  ;;  %v306_v10 = vld [vmem:[%s1391_s10 + $0x30] sm:$0xff]  ;;  %v305_v11 = vld [vmem:[%s1391_s10 + $0x28] sm:$0xff]  ;;  %v304_v12 = vld [vmem:[%s1391_s10 + $0x20] sm:$0xff] }
  0x74   : > { %736 = vmatpush3.msra.mxu0 %v314_v2  ;;  %806 = vmatpush3.msra.mxu1 %v314_v2  ;;  %v303_v13 = vld [vmem:[%s1391_s10 + $0x18] sm:$0xff]  ;;  %v302_v14 = vld [vmem:[%s1391_s10 + $0x10] sm:$0xff]  ;;  %v301_v15 = vld [vmem:[%s1391_s10 + $0x8] sm:$0xff] }
  0x75   : > { %737 = vmatprep.subr.mxu0 %v313_v3  ;;  %791 = vmatprep.subr.mxu1 %v313_v3  ;;  %v300_v16 = vld [vmem:[%s1391_s10] sm:$0xff]  ;;  %v285_v19 = vld [vmem:[%s1384_s3 + $0x8] sm:$0xff]  ;;  %v286_v21 = vld [vmem:[%s1384_s3 + $0x10] sm:$0xff] }
  0x76   : > { %738 = vmatpush3.msra.mxu0 %v313_v3  ;;  %807 = vmatpush3.msra.mxu1 %v313_v3  ;;  %v284_v17 = vld [vmem:[%s1384_s3] sm:$0xff]  ;;  %v293_v20 = vld [vmem:[%s1384_s3 + $0x48] sm:$0xff]  ;;  %v294_v22 = vld [vmem:[%s1384_s3 + $0x50] sm:$0xff]  ;;  %p691_p1 = scmp.ne.s32.totalorder %s1575_s2, 1 }
  0x77   : > { %739 = vmatprep.subr.mxu0 %v312_v4  ;;  %792 = vmatprep.subr.mxu1 %v312_v4  ;;  %v292_v18 = vld [vmem:[%s1384_s3 + $0x40] sm:$0xff]  ;;  %v287_v23 = vld [vmem:[%s1384_s3 + $0x18] sm:$0xff]  ;;  %v289_v27 = vld [vmem:[%s1384_s3 + $0x28] sm:$0xff]  ;;  %s1576_s15 = sld [smem:[#allocation19_spill]] (!%p691_p1) }
  0x78   : > { %740 = vmatpush3.msra.mxu0 %v312_v4  ;;  %808 = vmatpush3.msra.mxu1 %v312_v4  ;;  %v295_v24 = vld [vmem:[%s1384_s3 + $0x58] sm:$0xff]  ;;  %v288_v25 = vld [vmem:[%s1384_s3 + $0x20] sm:$0xff]  ;;  %v297_v28 = vld [vmem:[%s1384_s3 + $0x68] sm:$0xff] }
  0x79   : > { %741 = vmatprep.subr.mxu0 %v311_v5  ;;  %793 = vmatprep.subr.mxu1 %v311_v5  ;;  %v296_v26 = vld [vmem:[%s1384_s3 + $0x60] sm:$0xff]  ;;  %v290_v29 = vld [vmem:[%s1384_s3 + $0x30] sm:$0xff]  ;;  %v291_v31 = vld [vmem:[%s1384_s3 + $0x38] sm:$0xff] }
  0x7a   : > { %742 = vmatpush3.msra.mxu0 %v311_v5  ;;  %809 = vmatpush3.msra.mxu1 %v311_v5  ;;  %v298_v30 = vld [vmem:[%s1384_s3 + $0x70] sm:$0xff]  ;;  %v299_v32 = vld [vmem:[%s1384_s3 + $0x78] sm:$0xff]  ;;  %v269_v33 = vld [vmem:[#allocation2] sm:$0xff] }
  0x7b   : > { %743 = vmatprep.subr.mxu0 %v310_v6  ;;  %794 = vmatprep.subr.mxu1 %v310_v6  ;;  %v277_v34 = vld [vmem:[#allocation2 + $0x20] sm:$0xff]  ;;  %v268_v37 = vld [vmem:[#allocation2 + $0x30] sm:$0xff]  ;;  %v271_v43 = vld [vmem:[#allocation2 + $0x18] sm:$0xff] }
  0x7c   : > { %744 = vmatpush3.msra.mxu0 %v310_v6  ;;  %810 = vmatpush3.msra.mxu1 %v310_v6  ;;  %v276_v38 = vld [vmem:[#allocation2 + $0x40] sm:$0xff]  ;;  %v279_v44 = vld [vmem:[#allocation2 + $0x38] sm:$0xff]  ;;  %v278_v50 = vld [vmem:[#allocation2 + $0x10] sm:$0xff] }
  0x7d   : > { %745 = vmatprep.subr.mxu0 %v309_v7  ;;  %795 = vmatprep.subr.mxu1 %v309_v7  ;;  %v270_v49 = vld [vmem:[#allocation2 + $0x58] sm:$0xff]  ;;  %v273_v55 = vld [vmem:[#allocation2 + $0x68] sm:$0xff]  ;;  %v281_v56 = vld [vmem:[#allocation2 + $0x70] sm:$0xff] }
  0x7e   : > { %746 = vmatpush3.msra.mxu0 %v309_v7  ;;  %811 = vmatpush3.msra.mxu1 %v309_v7  ;;  %v272_v61 = vld [vmem:[#allocation2 + $0x50] sm:$0xff]  ;;  %v280_v62 = vld [vmem:[#allocation2 + $0x60] sm:$0xff]  ;;  %v275_v3 = vld [vmem:[#allocation2 + $0x48] sm:$0xff] }
  0x7f   : > { %747 = vmatprep.subr.mxu0 %v308_v8  ;;  %796 = vmatprep.subr.mxu1 %v308_v8  ;;  %v283_v4 = vld [vmem:[#allocation2 + $0x28] sm:$0xff] }
  0x80   : > { %748 = vmatpush3.msra.mxu0 %v308_v8  ;;  %812 = vmatpush3.msra.mxu1 %v308_v8 }
  0x81   : > { %749 = vmatprep.subr.mxu0 %v307_v9  ;;  %797 = vmatprep.subr.mxu1 %v307_v9 }
  0x82   : > { %750 = vmatpush3.msra.mxu0 %v307_v9  ;;  %813 = vmatpush3.msra.mxu1 %v307_v9  ;;  %v274_v9 = vld [vmem:[#allocation2 + $0x8] sm:$0xff] }
  0x83   : > { %751 = vmatprep.subr.mxu0 %v306_v10  ;;  %798 = vmatprep.subr.mxu1 %v306_v10 }
  0x84   : > { %752 = vmatpush3.msra.mxu0 %v306_v10  ;;  %814 = vmatpush3.msra.mxu1 %v306_v10  ;;  %v282_v10 = vld [vmem:[#allocation2 + $0x78] sm:$0xff] }
  0x85   : > { %753 = vmatprep.subr.mxu0 %v305_v11  ;;  %799 = vmatprep.subr.mxu1 %v305_v11 }
  0x86   : > { %754 = vmatpush3.msra.mxu0 %v305_v11  ;;  %815 = vmatpush3.msra.mxu1 %v305_v11 }
  0x87   : > { %755 = vmatprep.subr.mxu0 %v304_v12  ;;  %800 = vmatprep.subr.mxu1 %v304_v12 }
  0x88   : > { %756 = vmatpush3.msra.mxu0 %v304_v12  ;;  %816 = vmatpush3.msra.mxu1 %v304_v12 }
  0x89   : > { %757 = vmatprep.subr.mxu0 %v303_v13  ;;  %801 = vmatprep.subr.mxu1 %v303_v13 }
  0x8a   : > { %758 = vmatpush3.msra.mxu0 %v303_v13  ;;  %817 = vmatpush3.msra.mxu1 %v303_v13 }
  0x8b   : > { %759 = vmatprep.subr.mxu0 %v302_v14  ;;  %802 = vmatprep.subr.mxu1 %v302_v14 }
  0x8c   : > { %760 = vmatpush3.msra.mxu0 %v302_v14  ;;  %818 = vmatpush3.msra.mxu1 %v302_v14 }
  0x8d   : > { %761 = vmatprep.subr.mxu0 %v301_v15  ;;  %803 = vmatprep.subr.mxu1 %v301_v15 }
  0x8e   : > { %762 = vmatpush3.msra.mxu0 %v301_v15  ;;  %819 = vmatpush3.msra.mxu1 %v301_v15 }
  0x8f   : > { %763 = vmatprep.subr.mxu0 %v300_v16  ;;  %804 = vmatprep.subr.mxu1 %v300_v16 }
  0x90   : > { %764 = vmatpush3.msra.mxu0 %v300_v16  ;;  %820 = vmatpush3.msra.mxu1 %v300_v16 }
  0x91   : > { %765 = vmatprep.mubr.f32.mxu0 %v284_v17  ;;  %777 = vmatprep.mubr.f32.mxu1 %v292_v18 }
  0x92   : > { %766 = vmatmul.mubr.f32.vlgmr.msra.gmra.mxu0 %v285_v19  ;;  %778 = vmatmul.mubr.f32.vlgmr.msra.gmra.mxu1 %v293_v20 }
  0x93   : > { %768 = vmatprep.mubr.f32.mxu0 %v286_v21  ;;  %780 = vmatprep.mubr.f32.mxu1 %v294_v22 }
  0x96   : > { %769 = vmatmul.mubr.f32.gmra.mxu0 %v287_v23  ;;  %781 = vmatmul.mubr.f32.gmra.mxu1 %v295_v24 }
  0x97   : > { %771 = vmatprep.mubr.f32.mxu0 %v288_v25  ;;  %783 = vmatprep.mubr.f32.mxu1 %v296_v26 }
  0x9a   : > { %772 = vmatmul.mubr.f32.gmra.mxu0 %v289_v27  ;;  %784 = vmatmul.mubr.f32.gmra.mxu1 %v297_v28 }
  0x9b   : > { %774 = vmatprep.mubr.f32.mxu0 %v290_v29  ;;  %786 = vmatprep.mubr.f32.mxu1 %v298_v30 }
  0x9e   : > { %775 = vmatmul.mubr.f32.gmra.mxu0 %v291_v31  ;;  %787 = vmatmul.mubr.f32.gmra.mxu1 %v299_v32 }
 0x152   : > { %v767_v35 = vpop.f32.mrf.mxu0  ;;  %v779_v36 = vpop.f32.mrf.mxu1 }
 0x153   : > { %v462_v39 = vadd.f32 %v767_v35, %v269_v33  ;;  %v470_v40 = vadd.f32 %v779_v36, %v277_v34 }
 0x154   : > { %v382_v41 = vpop.f32.mrf.mxu0  ;;  %v422_v42 = vpop.f32.mrf.mxu1 }
 0x155   : > { %478 = vst [vmem:[#allocation2] sm:$0xff] %v462_v39  ;;  %486 = vst [vmem:[#allocation2 + $0x20] sm:$0xff] %v470_v40  ;;  %v461_v45 = vadd.f32 %v382_v41, %v268_v37  ;;  %v469_v46 = vadd.f32 %v422_v42, %v276_v38 }
 0x156   : > { %v770_v47 = vpop.f32.mrf.mxu0  ;;  %v782_v48 = vpop.f32.mrf.mxu1 }
 0x157   : > { %477 = vst [vmem:[#allocation2 + $0x30] sm:$0xff] %v461_v45  ;;  %485 = vst [vmem:[#allocation2 + $0x40] sm:$0xff] %v469_v46  ;;  %v464_v51 = vadd.f32 %v770_v47, %v271_v43  ;;  %v472_v52 = vadd.f32 %v782_v48, %v279_v44 }
 0x158   : > { %v392_v53 = vpop.f32.mrf.mxu0  ;;  %v432_v54 = vpop.f32.mrf.mxu1 }
 0x159   : > { %480 = vst [vmem:[#allocation2 + $0x18] sm:$0xff] %v464_v51  ;;  %488 = vst [vmem:[#allocation2 + $0x38] sm:$0xff] %v472_v52  ;;  %v463_v57 = vadd.f32 %v392_v53, %v270_v49  ;;  %v471_v58 = vadd.f32 %v432_v54, %v278_v50 }
 0x15a   : > { %v773_v59 = vpop.f32.mrf.mxu0  ;;  %v785_v60 = vpop.f32.mrf.mxu1 }
 0x15b   : > { %479 = vst [vmem:[#allocation2 + $0x58] sm:$0xff] %v463_v57  ;;  %487 = vst [vmem:[#allocation2 + $0x10] sm:$0xff] %v471_v58  ;;  %v466_v63 = vadd.f32 %v773_v59, %v273_v55  ;;  %v474_v0 = vadd.f32 %v785_v60, %v281_v56 }
 0x15c   : > { %v402_v1 = vpop.f32.mrf.mxu0  ;;  %v442_v2 = vpop.f32.mrf.mxu1 }
 0x15d   : > { %482 = vst [vmem:[#allocation2 + $0x68] sm:$0xff] %v466_v63  ;;  %490 = vst [vmem:[#allocation2 + $0x70] sm:$0xff] %v474_v0  ;;  %v465_v5 = vadd.f32 %v402_v1, %v272_v61  ;;  %v473_v6 = vadd.f32 %v442_v2, %v280_v62 }
 0x15e   : > { %v776_v7 = vpop.f32.mrf.mxu0  ;;  %v788_v8 = vpop.f32.mrf.mxu1 }
 0x15f   : > { %481 = vst [vmem:[#allocation2 + $0x50] sm:$0xff] %v465_v5  ;;  %489 = vst [vmem:[#allocation2 + $0x60] sm:$0xff] %v473_v6  ;;  %v468_v11 = vadd.f32 %v776_v7, %v275_v3  ;;  %v476_v12 = vadd.f32 %v788_v8, %v283_v4  ;;  %496 = sbr.rel (%p691_p1) target bundleno = 367 (0x16f), region = 48 }
 0x160   : > { %v412_v13 = vpop.f32.mrf.mxu0  ;;  %v452_v14 = vpop.f32.mrf.mxu1 }
 0x161   : > { %484 = vst [vmem:[#allocation2 + $0x48] sm:$0xff] %v468_v11  ;;  %492 = vst [vmem:[#allocation2 + $0x28] sm:$0xff] %v476_v12  ;;  %v467_v15 = vadd.f32 %v412_v13, %v274_v9  ;;  %v475_v16 = vadd.f32 %v452_v14, %v282_v10 }
 0x163   : > { %483 = vst [vmem:[#allocation2 + $0x8] sm:$0xff] %v467_v15  ;;  %491 = vst [vmem:[#allocation2 + $0x78] sm:$0xff] %v475_v16 }
 0x164   : > { %v497_v17 = vld [vmem:[#allocation2 + $0x30] sm:$0xff]  ;;  %v692_v18 = vld [vmem:[%s1576_s15] ss:$0 sm:$0xff]  ;;  %v499_v22 = vld [vmem:[#allocation2 + $0x58] sm:$0xff] }
 0x165   : > { %v498_v19 = vld [vmem:[#allocation2] sm:$0xff]  ;;  %v520_v20 = vadd.f32 %v692_v18, %v497_v17  ;;  %v500_v23 = vld [vmem:[#allocation2 + $0x18] sm:$0xff]  ;;  %v522_v25 = vadd.f32 %v692_v18, %v499_v22  ;;  %v502_v28 = vld [vmem:[#allocation2 + $0x68] sm:$0xff] }
 0x166   : > { %v521_v21 = vadd.f32 %v692_v18, %v498_v19  ;;  %v501_v24 = vld [vmem:[#allocation2 + $0x50] sm:$0xff]  ;;  %v523_v26 = vadd.f32 %v692_v18, %v500_v23  ;;  %v525_v31 = vadd.f32 %v692_v18, %v502_v28  ;;  %v505_v34 = vld [vmem:[#allocation2 + $0x40] sm:$0xff]  ;;  %v508_v40 = vld [vmem:[#allocation2 + $0x38] sm:$0xff] }
 0x167   : > { %v524_v27 = vadd.f32 %v692_v18, %v501_v24  ;;  %536 = vst [vmem:[%s1400_s6] sm:$0xff] %v520_v20  ;;  %v506_v35 = vld [vmem:[#allocation2 + $0x20] sm:$0xff]  ;;  %v507_v36 = vld [vmem:[#allocation2 + $0x10] sm:$0xff]  ;;  %538 = vst [vmem:[%s1400_s6 + $0x10] sm:$0xff] %v522_v25  ;;  %v528_v37 = vadd.f32 %v692_v18, %v505_v34  ;;  %v531_v43 = vadd.f32 %v692_v18, %v508_v40 }
 0x168   : > { %v504_v30 = vld [vmem:[#allocation2 + $0x48] sm:$0xff]  ;;  %537 = vst [vmem:[%s1400_s6 + $0x8] sm:$0xff] %v521_v21  ;;  %539 = vst [vmem:[%s1400_s6 + $0x18] sm:$0xff] %v523_v26  ;;  %v529_v38 = vadd.f32 %v692_v18, %v506_v35  ;;  %v530_v39 = vadd.f32 %v692_v18, %v507_v36  ;;  %v509_v41 = vld [vmem:[#allocation2 + $0x60] sm:$0xff] }
 0x169   : > { %v527_v33 = vadd.f32 %v692_v18, %v504_v30  ;;  %540 = vst [vmem:[%s1400_s6 + $0x20] sm:$0xff] %v524_v27  ;;  %v510_v42 = vld [vmem:[#allocation2 + $0x70] sm:$0xff]  ;;  %541 = vst [vmem:[%s1400_s6 + $0x28] sm:$0xff] %v525_v31  ;;  %v532_v44 = vadd.f32 %v692_v18, %v509_v41  ;;  %v512_v47 = vld [vmem:[#allocation2 + $0x28] sm:$0xff] }
 0x16a   : > { %v503_v29 = vld [vmem:[#allocation2 + $0x8] sm:$0xff]  ;;  %v533_v45 = vadd.f32 %v692_v18, %v510_v42  ;;  %v511_v46 = vld [vmem:[#allocation2 + $0x78] sm:$0xff]  ;;  %544 = vst [vmem:[%s1400_s6 + $0x40] sm:$0xff] %v528_v37  ;;  %545 = vst [vmem:[%s1400_s6 + $0x48] sm:$0xff] %v529_v38  ;;  %v535_v49 = vadd.f32 %v692_v18, %v512_v47 }
 0x16b   : > { %v526_v32 = vadd.f32 %v692_v18, %v503_v29  ;;  %543 = vst [vmem:[%s1400_s6 + $0x38] sm:$0xff] %v527_v33  ;;  %546 = vst [vmem:[%s1400_s6 + $0x50] sm:$0xff] %v530_v39  ;;  %v534_v48 = vadd.f32 %v692_v18, %v511_v46 }
 0x16c   : > { %547 = vst [vmem:[%s1400_s6 + $0x58] sm:$0xff] %v531_v43  ;;  %548 = vst [vmem:[%s1400_s6 + $0x60] sm:$0xff] %v532_v44 }
 0x16d   : > { %542 = vst [vmem:[%s1400_s6 + $0x30] sm:$0xff] %v526_v32  ;;  %549 = vst [vmem:[%s1400_s6 + $0x68] sm:$0xff] %v533_v45 }
 0x16e   : > { %550 = vst [vmem:[%s1400_s6 + $0x70] sm:$0xff] %v534_v48  ;;  %551 = vst [vmem:[%s1400_s6 + $0x78] sm:$0xff] %v535_v49 }
 0x16f PF: > { %s1577_s26 = sld [smem:[#allocation14_spill]]  ;;  %s566_s30 = sshll.u32 %s1400_s6, 4  ;;  %s1462_s30 = int_to_ptr.vmem [resolvable:$true] %s566_s30 }
 0x170   : > { %s1578_s3 = sld [smem:[#allocation20_spill]]  ;;  %s1466_s21 = scalar_lea.sflag [#allocation5], %s242_s7 }
 0x171   : > { %s1014_s10 = scalar_lea.vmem %s1462_s30, 2048  ;;  %s1170_s4 = smov [#allocation8]  }
 0x172   : > { %p1015_p3 = scmp.ne.s32.totalorder %s1462_s30, %s1014_s10  ;;  %s1018_s5 = sshll.u32 %s1170_s4, 4  ;;  %s1019_s5 = int_to_ptr.vmem [resolvable:$false] %s1018_s5 }
 0x173   : > { %s1020_s2 = scalar_lea.vmem %s1019_s5, 4096  ;;  %p1021_p11 = scmp.lt.s32.totalorder %s1462_s30, %s1019_s5 }
 0x174   : > { %p1016_p0 = pnand %p1015_p3, %p1355_p7  ;;  %p1022_p4 = scmp.lt.s32.totalorder %s1020_s2, %s1014_s10 }
 0x175   : > { %s700_s18 = sshll.u32 %s1577_s26, 11 }
 0x176   : > { %s1459_s27 = scalar_lea.hbm %s1578_s3, %s700_s18  ;;  %p1017_p10 = pneg %p1016_p0 }
 0x177   : > { %p1023_p9 = por %p1022_p4, %p1021_p11 }
 0x179   : > { %p1024_p12 = pnand %p1023_p9, %p1017_p10 }
 0x17b   : > { %1027 = shalt.err (!%p1024_p12)
}
 0x17c   : > { %s1028_s7 = scalar_lea.hbm %s1459_s27, 2048  ;;  %s1032_s29 = scalar_lea.hbm %s1578_s3, 6144 }
 0x17d   : > { %p1029_p8 = scmp.ne.s32.totalorder %s1459_s27, %s1028_s7  ;;  %p1033_p13 = scmp.lt.s32.totalorder %s1459_s27, %s1578_s3 }
 0x17e   : > { %p1034_p1 = scmp.lt.s32.totalorder %s1032_s29, %s1028_s7 }
 0x17f   : > { %p1030_p6 = pnand %p1029_p8, %p1355_p7 }
 0x180   : > { %p1035_p3 = por %p1034_p1, %p1033_p13 }
 0x181   : > { %p1031_p2 = pneg %p1030_p6 }
 0x183   : > { %p1036_p0 = pnand %p1035_p3, %p1031_p2 }
 0x185   : > { %1039 = shalt.err (!%p1036_p0)
}
 0x186   : > { %s1171_s18 = smov 128   ;;  %s1172_s0 = smov 8  }
 0x187   : > { %825 = dma.vmem_to_hbm [thread:$0]  (%p1355_p7), %s1462_s30, 2048, %s1459_s27, %s1466_s21, %s1171_s18, %s1171_s18, %s1172_s0  }
 0x188 PF: > { %s1579_s1 = sld [smem:[#allocation12_spill]]  ;;  %p839_p10 = scmp.ge.s32.totalorder %s1162_s25, 2 }
 0x18a   : > { %p835_p11 = pnand %p839_p10, %p1361_p5 }
 0x18c   : > { %p836_p4 = pneg %p835_p11 }
 0x18e   : > { %s581_s10 = sand.u32 1, %s1579_s1  }
 0x18f   : > { %s582_s4 = scalar_lea.sflag [#allocation5], %s581_s10 }
 0x190   : > { %1105 = dma.done.wait (%p836_p4), %s582_s4, 2048  }
 0x191   : > { %1107 = vsyncadd (%p836_p4), %s582_s4, 4294965248  ;;  %s22_s25 = sadd.s32 1, %s1162_s25   ;;  %s1581_s28 = sld [smem:[#allocation15_spill]] }
 0x192   : > { %p1494_p9 = scmp.ge.s32.totalorder %s22_s25, 8   ;;  %s1582_s27 = sld [smem:[#allocation16_spill]] }
 0x193   : > { %s1583_s12 = smov %s1114_s13  ;;  %s1584_s13 = smov %s1118_s14 }
 0x194   : > { %s1585_s14 = smov %s1294_s8  ;;  %s1586_s15 = smov %s1126_s16 }
 0x195   : > { %s1587_s16 = smov %s1130_s17  ;;  %s1588_s17 = smov %s1332_s22 }
 0x196   : > { %s1589_s18 = smov %s1138_s19  ;;  %s1590_s19 = smov %s1142_s20 }
 0x197   : > { %s1591_s20 = smov %s1297_s9  ;;  %s1592_s21 = smov %s1154_s23 }
 0x198   : > { %s1593_s22 = smov %s1158_s24  ;;  %s1594_s23 = smov %s1581_s28 }
 0x199   : > { %s1595_s24 = smov %s1582_s27  ;;  %21 = sbr.rel (!%p1494_p9) target bundleno = 17 (0x11), region = 98 }
 0x19e   :  { %587 = vsyncpa [#allocation4], 1 }
 0x19f   :  { %589 = vsyncpa [#allocation4 + $0x1], 1 }
 0x1a0   :  { %590 = vsyncpa [#allocation7], 1 }
 0x1a1   :  { %592 = vsyncpa [#allocation7 + $0x1], 1 }
 0x1a2   :  { %593 = vsyncpa [#allocation5], 1 }
 0x1a3   :  { %595 = vsyncpa [#allocation5 + $0x1], 1 }

</bundles_post_ra>
